<compile_context>
chip_gen: v5e
topology: v5e:2x2
jax: 0.10.0
libtpu: 0.0.40
codegen_flags: <defaults>
</compile_context>

<pallas_src>
import math
from functools import partial

import jax
import jax.numpy as jnp
from jax import lax
from jax.experimental import pallas as pl
from jax.experimental.pallas import tpu as pltpu


# ----------------------------- fused MHA kernel -----------------------------

# contract last dim of LHS with last dim of RHS (x @ y.T without materializing y.T)
_CONTRACT_LAST = (((1,), (1,)), ((), ()))


def fused_mha_kernel(valid_ref, q_ref, k_ref, v_ref,
                     wq_ref, wk_ref, wv_ref, wo_ref, o_ref,
                     *, num_heads, batch_block):
    bt = batch_block
    b0 = pl.program_id(0) * bt

    Lq = q_ref.shape[1]
    Lk = k_ref.shape[1]
    H = wo_ref.shape[0]                       # wo_ref is pre-transposed (H, H)
    d = H // num_heads
    scale = jnp.float32(1.0 / math.sqrt(d))

    # ---- projections: 3 full-width matmuls on the flattened batch block ----
    q_flat = q_ref[...].reshape(bt * Lq, q_ref.shape[2])
    k_flat = k_ref[...].reshape(bt * Lk, k_ref.shape[2])
    v_flat = v_ref[...].reshape(bt * Lk, v_ref.shape[2])

    q_all = jnp.dot(q_flat, wq_ref[...], preferred_element_type=jnp.float32)  # (bt*Lq, H)
    k_all = jnp.dot(k_flat, wk_ref[...], preferred_element_type=jnp.float32)  # (bt*Lk, H)
    v_all = jnp.dot(v_flat, wv_ref[...], preferred_element_type=jnp.float32)  # (bt*Lk, H)

    # ---- scores stacked along sublanes; ONE masked-softmax pass ----
    # masked_softmax (1-D valid_lens path): key positions >= valid_len -> -1e6.
    # TODO(synk): the 2-D (per-query) valid_lens path of masked_softmax is not
    #             implemented; only per-batch lengths are handled here.
    col = lax.broadcasted_iota(jnp.int32, (num_heads * Lq, Lk), 1)

    groups = []
    for bi in range(bt):                                   # static unroll (tiny)
        keep = col < valid_ref[b0 + bi]
        s_heads = []
        for h in range(num_heads):
            qh = q_all[bi * Lq:(bi + 1) * Lq, h * d:(h + 1) * d]   # (Lq, d)
            kh = k_all[bi * Lk:(bi + 1) * Lk, h * d:(h + 1) * d]   # (Lk, d)
            s_heads.append(
                lax.dot_general(qh, kh, _CONTRACT_LAST,
                                preferred_element_type=jnp.float32) * scale)
        s_bi = jnp.concatenate(s_heads, axis=0)            # (num_heads*Lq, Lk)
        groups.append(jnp.where(keep, s_bi, jnp.float32(-1000000.0)))

    s = jnp.concatenate(groups, axis=0)                    # (bt*num_heads*Lq, Lk)
    s = s - jnp.max(s, axis=-1, keepdims=True)
    p = jnp.exp(s)
    p = p / jnp.sum(p, axis=-1, keepdims=True)             # exact divide (per feedback)
    # TODO(synk): nn.Dropout on attention weights is identity in eval mode; omitted.

    # ---- per-head PV matmul, accumulated straight into W_o column blocks ----
    for bi in range(bt):
        acc = jnp.zeros((Lq, H), jnp.float32)
        for h in range(num_heads):
            r0 = (bi * num_heads + h) * Lq
            p_bh = p[r0:r0 + Lq, :]                                     # sublane slice
            vh = v_all[bi * Lk:(bi + 1) * Lk, h * d:(h + 1) * d]        # (Lk, d)
            head_out = jnp.dot(p_bh, vh, preferred_element_type=jnp.float32)  # (Lq, d)
            acc = acc + jnp.dot(head_out, wo_ref[h * d:(h + 1) * d, :],
                                preferred_element_type=jnp.float32)     # (Lq, H)
        o_ref[bi] = acc.astype(o_ref.dtype)
    # TODO(synk): for production num_heads (>=16), switch the head loop to
    #             lax.fori_loop(..., unroll=True) with a VMEM scratch accumulator
    #             to bound vreg live ranges.


@partial(jax.jit, static_argnames=("num_heads", "batch_block"))
def multi_head_attention(params, queries, keys, values, valid_lens, num_heads,
                         batch_block=1):
    B, Lq, Dq = queries.shape
    _, Lk, Dk = keys.shape
    Dv = values.shape[2]
    H = params["W_o"].shape[0]
    assert B % batch_block == 0
    bt = batch_block

    if valid_lens is None:
        vl = jnp.full((B,), Lk, dtype=jnp.int32)
    else:
        vl = valid_lens.astype(jnp.int32)      # one length per batch; shared by heads

    # Pre-transpose once so every in-kernel matmul is a plain rows-x-cols MXU
    # contraction and W_o head blocks are sublane-aligned row slices.
    # (For production, store the weights pre-transposed instead.)
    wq_t = params["W_q"].T                     # (Dq, H)
    wk_t = params["W_k"].T                     # (Dk, H)
    wv_t = params["W_v"].T                     # (Dv, H)
    wo_t = params["W_o"].T                     # (H,  H)

    kernel = partial(fused_mha_kernel, num_heads=num_heads, batch_block=bt)

    grid_spec = pltpu.PrefetchScalarGridSpec(
        num_scalar_prefetch=1,
        grid=(B // bt,),
        in_specs=[
            pl.BlockSpec((bt, Lq, Dq), lambda b, vl: (b, 0, 0)),
            pl.BlockSpec((bt, Lk, Dk), lambda b, vl: (b, 0, 0)),
            pl.BlockSpec((bt, Lk, Dv), lambda b, vl: (b, 0, 0)),
            pl.BlockSpec((Dq, H), lambda b, vl: (0, 0)),   # weights resident across grid
            pl.BlockSpec((Dk, H), lambda b, vl: (0, 0)),
            pl.BlockSpec((Dv, H), lambda b, vl: (0, 0)),
            pl.BlockSpec((H, H), lambda b, vl: (0, 0)),
        ],
        out_specs=pl.BlockSpec((bt, Lq, H), lambda b, vl: (b, 0, 0)),
    )

    return pl.pallas_call(
        kernel,
        out_shape=jax.ShapeDtypeStruct((B, Lq, H), queries.dtype),
        grid_spec=grid_spec,
        compiler_params=pltpu.CompilerParams(dimension_semantics=("parallel",)),
    )(vl, queries, keys, values, wq_t, wk_t, wv_t, wo_t)


# --------------------------- pure-JAX reference ----------------------------

def _transpose_qkv(x, num_heads):
    B, L, H = x.shape
    x = x.reshape(B, L, num_heads, H // num_heads)
    x = jnp.transpose(x, (0, 2, 1, 3))
    return x.reshape(B * num_heads, L, H // num_heads)


def _transpose_output(x, num_heads):
    BH, L, d = x.shape
    B = BH // num_heads
    x = x.reshape(B, num_heads, L, d)
    x = jnp.transpose(x, (0, 2, 1, 3))
    return x.reshape(B, L, num_heads * d)


def reference_mha(params, queries, keys, values, valid_lens, num_heads):
    with jax.default_matmul_precision("highest"):
        Lk = keys.shape[1]
        q = _transpose_qkv(queries @ params["W_q"].T, num_heads)
        k = _transpose_qkv(keys @ params["W_k"].T, num_heads)
        v = _transpose_qkv(values @ params["W_v"].T, num_heads)
        d = q.shape[-1]
        scores = jnp.einsum("bqd,bkd->bqk", q, k) / math.sqrt(d)
        if valid_lens is not None:
            vl = jnp.repeat(valid_lens.astype(jnp.int32), num_heads, axis=0)
            col = jnp.arange(Lk)[None, None, :]
            scores = jnp.where(col < vl[:, None, None], scores, -1000000.0)
        w = jax.nn.softmax(scores, axis=-1)
        out = jnp.einsum("bqk,bkd->bqd", w, v)
        out = _transpose_output(out, num_heads)
        return out @ params["W_o"].T


# --------------------------------- main ------------------------------------

if __name__ == "__main__":
    B = 2
    Lq = 8
    Lk = 8
    key_size = query_size = value_size = 32
    num_hiddens = 32
    num_heads = 4

    key = jax.random.PRNGKey(0)
    k_q, k_k, k_v, k_wq, k_wk, k_wv, k_wo, _ = jax.random.split(key, 8)

    queries = jax.random.normal(k_q, (B, Lq, query_size), dtype=jnp.float32)
    keys = jax.random.normal(k_k, (B, Lk, key_size), dtype=jnp.float32)
    values = jax.random.normal(k_v, (B, Lk, value_size), dtype=jnp.float32)
    valid_lens = jnp.array([3, 6], dtype=jnp.int32)

    def init_linear(rng, out_f, in_f):
        bound = 1.0 / math.sqrt(in_f)
        return jax.random.uniform(
            rng, (out_f, in_f), minval=-bound, maxval=bound, dtype=jnp.float32
        )

    params = {
        "W_q": init_linear(k_wq, num_hiddens, query_size),
        "W_k": init_linear(k_wk, num_hiddens, key_size),
        "W_v": init_linear(k_wv, num_hiddens, value_size),
        "W_o": init_linear(k_wo, num_hiddens, num_hiddens),
    }

    # v7x-style split: one batch per grid step ("parallel" -> one per TensorCore).
    out_split = multi_head_attention(params, queries, keys, values, valid_lens,
                                     num_heads, batch_block=1)
    # v5e/v6e-style folding: whole batch in a single grid step (no per-step overhead).
    out_folded = multi_head_attention(params, queries, keys, values, valid_lens,
                                      num_heads, batch_block=B)
    out_split, out_folded = jax.block_until_ready((out_split, out_folded))

    ref = reference_mha(params, queries, keys, values, valid_lens, num_heads)
    assert out_split.shape == (B, Lq, num_hiddens)
    assert out_folded.shape == (B, Lq, num_hiddens)
    assert jnp.allclose(out_split, ref, atol=1e-4, rtol=1e-4), "split mismatch vs reference"
    assert jnp.allclose(out_folded, ref, atol=1e-4, rtol=1e-4), "folded mismatch vs reference"

    print("KERNEL_OK")
</pallas_src>

<mosaic_0001>
module attributes {stable_mosaic.version = 11 : i64} {
  func.func @fused_mha_kernel(%arg0: i32, %arg1: memref<2xi32, #tpu.memory_space<smem>>, %arg2: memref<1x8x32xf32, #tpu.memory_space<vmem>>, %arg3: memref<1x8x32xf32, #tpu.memory_space<vmem>>, %arg4: memref<1x8x32xf32, #tpu.memory_space<vmem>>, %arg5: memref<32x32xf32, #tpu.memory_space<vmem>>, %arg6: memref<32x32xf32, #tpu.memory_space<vmem>>, %arg7: memref<32x32xf32, #tpu.memory_space<vmem>>, %arg8: memref<32x32xf32, #tpu.memory_space<vmem>>, %arg9: memref<1x8x32xf32, #tpu.memory_space<vmem>>) attributes {dimension_semantics = [#tpu.dimension_semantics<parallel>], iteration_bounds = array<i64: 2>, scalar_prefetch = 1 : i64, scratch_operands = 0 : i64, tpu.core_type = #tpu.core_type<tc>, window_params = [{transform_indices = @transform_0, window_bounds = array<i64: 1, 8, 32>}, {transform_indices = @transform_1, window_bounds = array<i64: 1, 8, 32>}, {transform_indices = @transform_2, window_bounds = array<i64: 1, 8, 32>}, {pipeline_mode = #tpu.pipeline_mode<synchronous>, transform_indices = @transform_3, window_bounds = array<i64: 32, 32>}, {pipeline_mode = #tpu.pipeline_mode<synchronous>, transform_indices = @transform_4, window_bounds = array<i64: 32, 32>}, {pipeline_mode = #tpu.pipeline_mode<synchronous>, transform_indices = @transform_5, window_bounds = array<i64: 32, 32>}, {pipeline_mode = #tpu.pipeline_mode<synchronous>, transform_indices = @transform_6, window_bounds = array<i64: 32, 32>}, {transform_indices = @transform_7, window_bounds = array<i64: 1, 8, 32>}]} {
    %c1_i32 = arith.constant 1 : i32
    %0 = arith.muli %arg0, %c1_i32 : i32
    %c0 = arith.constant 0 : index
    %c0_0 = arith.constant 0 : index
    %c0_1 = arith.constant 0 : index
    %1 = vector.load %arg2[%c0, %c0_0, %c0_1] : memref<1x8x32xf32, #tpu.memory_space<vmem>>, vector<1x8x32xf32>
    %2 = vector.shape_cast %1 : vector<1x8x32xf32> to vector<8x32xf32>
    %c0_2 = arith.constant 0 : index
    %c0_3 = arith.constant 0 : index
    %c0_4 = arith.constant 0 : index
    %3 = vector.load %arg3[%c0_2, %c0_3, %c0_4] : memref<1x8x32xf32, #tpu.memory_space<vmem>>, vector<1x8x32xf32>
    %4 = vector.shape_cast %3 : vector<1x8x32xf32> to vector<8x32xf32>
    %c0_5 = arith.constant 0 : index
    %c0_6 = arith.constant 0 : index
    %c0_7 = arith.constant 0 : index
    %5 = vector.load %arg4[%c0_5, %c0_6, %c0_7] : memref<1x8x32xf32, #tpu.memory_space<vmem>>, vector<1x8x32xf32>
    %6 = vector.shape_cast %5 : vector<1x8x32xf32> to vector<8x32xf32>
    %c0_8 = arith.constant 0 : index
    %c0_9 = arith.constant 0 : index
    %7 = vector.load %arg5[%c0_8, %c0_9] : memref<32x32xf32, #tpu.memory_space<vmem>>, vector<32x32xf32>
    %cst = arith.constant dense<0.000000e+00> : vector<8x32xf32>
    %8 = tpu.matmul %2, %7, %cst {dimension_numbers = #tpu.dot_dimension_numbers<[1], [0], [0], [1], [0, 0, 1, 1], [], []>} : vector<8x32xf32>, vector<32x32xf32>, vector<8x32xf32> -> vector<8x32xf32>
    %c0_10 = arith.constant 0 : index
    %c0_11 = arith.constant 0 : index
    %9 = vector.load %arg6[%c0_10, %c0_11] : memref<32x32xf32, #tpu.memory_space<vmem>>, vector<32x32xf32>
    %cst_12 = arith.constant dense<0.000000e+00> : vector<8x32xf32>
    %10 = tpu.matmul %4, %9, %cst_12 {dimension_numbers = #tpu.dot_dimension_numbers<[1], [0], [0], [1], [0, 0, 1, 1], [], []>} : vector<8x32xf32>, vector<32x32xf32>, vector<8x32xf32> -> vector<8x32xf32>
    %c0_13 = arith.constant 0 : index
    %c0_14 = arith.constant 0 : index
    %11 = vector.load %arg7[%c0_13, %c0_14] : memref<32x32xf32, #tpu.memory_space<vmem>>, vector<32x32xf32>
    %cst_15 = arith.constant dense<0.000000e+00> : vector<8x32xf32>
    %12 = tpu.matmul %6, %11, %cst_15 {dimension_numbers = #tpu.dot_dimension_numbers<[1], [0], [0], [1], [0, 0, 1, 1], [], []>} : vector<8x32xf32>, vector<32x32xf32>, vector<8x32xf32> -> vector<8x32xf32>
    %13 = tpu.iota {dimensions = array<i32: 1>} : vector<32x8xi32>
    %c0_i32 = arith.constant 0 : i32
    %14 = arith.addi %0, %c0_i32 : i32
    %15 = arith.index_cast %14 : i32 to index
    %16 = memref.load %arg1[%15] : memref<2xi32, #tpu.memory_space<smem>>
    %17 = vector.broadcast %16 : i32 to vector<32x8xi32>
    %18 = arith.cmpi slt, %13, %17 : vector<32x8xi32>
    %19 = vector.extract_strided_slice %8 {offsets = [0, 0], sizes = [8, 8], strides = [1, 1]} : vector<8x32xf32> to vector<8x8xf32>
    %20 = vector.extract_strided_slice %10 {offsets = [0, 0], sizes = [8, 8], strides = [1, 1]} : vector<8x32xf32> to vector<8x8xf32>
    %cst_16 = arith.constant dense<0.000000e+00> : vector<8x8xf32>
    %21 = tpu.matmul %19, %20, %cst_16 {dimension_numbers = #tpu.dot_dimension_numbers<[1], [1], [0], [0], [0, 0, 1, 0], [], []>} : vector<8x8xf32>, vector<8x8xf32>, vector<8x8xf32> -> vector<8x8xf32>
    %cst_17 = arith.constant 0.353553385 : f32
    %22 = vector.broadcast %cst_17 : f32 to vector<8x8xf32>
    %23 = arith.mulf %21, %22 : vector<8x8xf32>
    %24 = vector.extract_strided_slice %8 {offsets = [0, 8], sizes = [8, 8], strides = [1, 1]} : vector<8x32xf32> to vector<8x8xf32>
    %25 = vector.extract_strided_slice %10 {offsets = [0, 8], sizes = [8, 8], strides = [1, 1]} : vector<8x32xf32> to vector<8x8xf32>
    %cst_18 = arith.constant dense<0.000000e+00> : vector<8x8xf32>
    %26 = tpu.matmul %24, %25, %cst_18 {dimension_numbers = #tpu.dot_dimension_numbers<[1], [1], [0], [0], [0, 0, 1, 0], [], []>} : vector<8x8xf32>, vector<8x8xf32>, vector<8x8xf32> -> vector<8x8xf32>
    %cst_19 = arith.constant 0.353553385 : f32
    %27 = vector.broadcast %cst_19 : f32 to vector<8x8xf32>
    %28 = arith.mulf %26, %27 : vector<8x8xf32>
    %29 = vector.extract_strided_slice %8 {offsets = [0, 16], sizes = [8, 8], strides = [1, 1]} : vector<8x32xf32> to vector<8x8xf32>
    %30 = vector.extract_strided_slice %10 {offsets = [0, 16], sizes = [8, 8], strides = [1, 1]} : vector<8x32xf32> to vector<8x8xf32>
    %cst_20 = arith.constant dense<0.000000e+00> : vector<8x8xf32>
    %31 = tpu.matmul %29, %30, %cst_20 {dimension_numbers = #tpu.dot_dimension_numbers<[1], [1], [0], [0], [0, 0, 1, 0], [], []>} : vector<8x8xf32>, vector<8x8xf32>, vector<8x8xf32> -> vector<8x8xf32>
    %cst_21 = arith.constant 0.353553385 : f32
    %32 = vector.broadcast %cst_21 : f32 to vector<8x8xf32>
    %33 = arith.mulf %31, %32 : vector<8x8xf32>
    %34 = vector.extract_strided_slice %8 {offsets = [0, 24], sizes = [8, 8], strides = [1, 1]} : vector<8x32xf32> to vector<8x8xf32>
    %35 = vector.extract_strided_slice %10 {offsets = [0, 24], sizes = [8, 8], strides = [1, 1]} : vector<8x32xf32> to vector<8x8xf32>
    %cst_22 = arith.constant dense<0.000000e+00> : vector<8x8xf32>
    %36 = tpu.matmul %34, %35, %cst_22 {dimension_numbers = #tpu.dot_dimension_numbers<[1], [1], [0], [0], [0, 0, 1, 0], [], []>} : vector<8x8xf32>, vector<8x8xf32>, vector<8x8xf32> -> vector<8x8xf32>
    %cst_23 = arith.constant 0.353553385 : f32
    %37 = vector.broadcast %cst_23 : f32 to vector<8x8xf32>
    %38 = arith.mulf %36, %37 : vector<8x8xf32>
    %39 = tpu.concatenate %23, %28, %33, %38 in 0 : vector<8x8xf32>, vector<8x8xf32>, vector<8x8xf32>, vector<8x8xf32> -> vector<32x8xf32>
    %cst_24 = arith.constant -1.000000e+06 : f32
    %40 = vector.broadcast %cst_24 : f32 to vector<32x8xf32>
    %41 = arith.select %18, %39, %40 : vector<32x8xi1>, vector<32x8xf32>
    %cst_25 = arith.constant dense<0xFF800000> : vector<32xf32>
    %42 = vector.multi_reduction <maximumf>, %41, %cst_25 [1] : vector<32x8xf32> to vector<32xf32>
    %43 = vector.shape_cast %42 : vector<32xf32> to vector<32x1xf32>
    %44 = vector.broadcast %43 : vector<32x1xf32> to vector<32x8xf32>
    %45 = arith.subf %41, %44 : vector<32x8xf32>
    %46 = math.exp %45 : vector<32x8xf32>
    %cst_26 = arith.constant dense<0.000000e+00> : vector<32xf32>
    %47 = vector.multi_reduction <add>, %46, %cst_26 [1] : vector<32x8xf32> to vector<32xf32>
    %48 = vector.shape_cast %47 : vector<32xf32> to vector<32x1xf32>
    %49 = vector.broadcast %48 : vector<32x1xf32> to vector<32x8xf32>
    %50 = arith.divf %46, %49 : vector<32x8xf32>
    %cst_27 = arith.constant 0.000000e+00 : f32
    %51 = vector.broadcast %cst_27 : f32 to vector<8x32xf32>
    %52 = vector.extract_strided_slice %50 {offsets = [0, 0], sizes = [8, 8], strides = [1, 1]} : vector<32x8xf32> to vector<8x8xf32>
    %53 = vector.extract_strided_slice %12 {offsets = [0, 0], sizes = [8, 8], strides = [1, 1]} : vector<8x32xf32> to vector<8x8xf32>
    %cst_28 = arith.constant dense<0.000000e+00> : vector<8x8xf32>
    %54 = tpu.matmul %52, %53, %cst_28 {dimension_numbers = #tpu.dot_dimension_numbers<[1], [0], [0], [1], [0, 0, 1, 1], [], []>} : vector<8x8xf32>, vector<8x8xf32>, vector<8x8xf32> -> vector<8x8xf32>
    %c0_29 = arith.constant 0 : index
    %c0_30 = arith.constant 0 : index
    %55 = vector.load %arg8[%c0_29, %c0_30] : memref<32x32xf32, #tpu.memory_space<vmem>>, vector<8x32xf32>
    %cst_31 = arith.constant dense<0.000000e+00> : vector<8x32xf32>
    %56 = tpu.matmul %54, %55, %cst_31 {dimension_numbers = #tpu.dot_dimension_numbers<[1], [0], [0], [1], [0, 0, 1, 1], [], []>} : vector<8x8xf32>, vector<8x32xf32>, vector<8x32xf32> -> vector<8x32xf32>
    %57 = arith.addf %51, %56 : vector<8x32xf32>
    %58 = vector.extract_strided_slice %50 {offsets = [8, 0], sizes = [8, 8], strides = [1, 1]} : vector<32x8xf32> to vector<8x8xf32>
    %59 = vector.extract_strided_slice %12 {offsets = [0, 8], sizes = [8, 8], strides = [1, 1]} : vector<8x32xf32> to vector<8x8xf32>
    %cst_32 = arith.constant dense<0.000000e+00> : vector<8x8xf32>
    %60 = tpu.matmul %58, %59, %cst_32 {dimension_numbers = #tpu.dot_dimension_numbers<[1], [0], [0], [1], [0, 0, 1, 1], [], []>} : vector<8x8xf32>, vector<8x8xf32>, vector<8x8xf32> -> vector<8x8xf32>
    %c8 = arith.constant 8 : index
    %c0_33 = arith.constant 0 : index
    %61 = vector.load %arg8[%c8, %c0_33] : memref<32x32xf32, #tpu.memory_space<vmem>>, vector<8x32xf32>
    %cst_34 = arith.constant dense<0.000000e+00> : vector<8x32xf32>
    %62 = tpu.matmul %60, %61, %cst_34 {dimension_numbers = #tpu.dot_dimension_numbers<[1], [0], [0], [1], [0, 0, 1, 1], [], []>} : vector<8x8xf32>, vector<8x32xf32>, vector<8x32xf32> -> vector<8x32xf32>
    %63 = arith.addf %57, %62 : vector<8x32xf32>
    %64 = vector.extract_strided_slice %50 {offsets = [16, 0], sizes = [8, 8], strides = [1, 1]} : vector<32x8xf32> to vector<8x8xf32>
    %65 = vector.extract_strided_slice %12 {offsets = [0, 16], sizes = [8, 8], strides = [1, 1]} : vector<8x32xf32> to vector<8x8xf32>
    %cst_35 = arith.constant dense<0.000000e+00> : vector<8x8xf32>
    %66 = tpu.matmul %64, %65, %cst_35 {dimension_numbers = #tpu.dot_dimension_numbers<[1], [0], [0], [1], [0, 0, 1, 1], [], []>} : vector<8x8xf32>, vector<8x8xf32>, vector<8x8xf32> -> vector<8x8xf32>
    %c16 = arith.constant 16 : index
    %c0_36 = arith.constant 0 : index
    %67 = vector.load %arg8[%c16, %c0_36] : memref<32x32xf32, #tpu.memory_space<vmem>>, vector<8x32xf32>
    %cst_37 = arith.constant dense<0.000000e+00> : vector<8x32xf32>
    %68 = tpu.matmul %66, %67, %cst_37 {dimension_numbers = #tpu.dot_dimension_numbers<[1], [0], [0], [1], [0, 0, 1, 1], [], []>} : vector<8x8xf32>, vector<8x32xf32>, vector<8x32xf32> -> vector<8x32xf32>
    %69 = arith.addf %63, %68 : vector<8x32xf32>
    %70 = vector.extract_strided_slice %50 {offsets = [24, 0], sizes = [8, 8], strides = [1, 1]} : vector<32x8xf32> to vector<8x8xf32>
    %71 = vector.extract_strided_slice %12 {offsets = [0, 24], sizes = [8, 8], strides = [1, 1]} : vector<8x32xf32> to vector<8x8xf32>
    %cst_38 = arith.constant dense<0.000000e+00> : vector<8x8xf32>
    %72 = tpu.matmul %70, %71, %cst_38 {dimension_numbers = #tpu.dot_dimension_numbers<[1], [0], [0], [1], [0, 0, 1, 1], [], []>} : vector<8x8xf32>, vector<8x8xf32>, vector<8x8xf32> -> vector<8x8xf32>
    %c24 = arith.constant 24 : index
    %c0_39 = arith.constant 0 : index
    %73 = vector.load %arg8[%c24, %c0_39] : memref<32x32xf32, #tpu.memory_space<vmem>>, vector<8x32xf32>
    %cst_40 = arith.constant dense<0.000000e+00> : vector<8x32xf32>
    %74 = tpu.matmul %72, %73, %cst_40 {dimension_numbers = #tpu.dot_dimension_numbers<[1], [0], [0], [1], [0, 0, 1, 1], [], []>} : vector<8x8xf32>, vector<8x32xf32>, vector<8x32xf32> -> vector<8x32xf32>
    %75 = arith.addf %69, %74 : vector<8x32xf32>
    %c0_41 = arith.constant 0 : index
    %c0_42 = arith.constant 0 : index
    %c0_43 = arith.constant 0 : index
    %76 = vector.load %arg9[%c0_41, %c0_42, %c0_43] : memref<1x8x32xf32, #tpu.memory_space<vmem>>, vector<1x8x32xf32>
    %77 = vector.shape_cast %76 : vector<1x8x32xf32> to vector<8x32xf32>
    %78 = vector.shape_cast %75 : vector<8x32xf32> to vector<1x8x32xf32>
    tpu.vector_store %arg9[%c0_41, %c0_42, %c0_43], %78 {strides = array<i32>} : memref<1x8x32xf32, #tpu.memory_space<vmem>>, vector<1x8x32xf32>,
    return
  }
  func.func @transform_0(%arg0: i32, %arg1: memref<2xi32, #tpu.memory_space<smem>>) -> (i32, i32, i32) {
    %c0_i32 = arith.constant 0 : i32
    %c0_i32_0 = arith.constant 0 : i32
    %c0_i32_1 = arith.constant 0 : i32
    return %arg0, %c0_i32, %c0_i32_0 : i32, i32, i32
  }
  func.func @transform_1(%arg0: i32, %arg1: memref<2xi32, #tpu.memory_space<smem>>) -> (i32, i32, i32) {
    %c0_i32 = arith.constant 0 : i32
    %c0_i32_0 = arith.constant 0 : i32
    %c0_i32_1 = arith.constant 0 : i32
    return %arg0, %c0_i32, %c0_i32_0 : i32, i32, i32
  }
  func.func @transform_2(%arg0: i32, %arg1: memref<2xi32, #tpu.memory_space<smem>>) -> (i32, i32, i32) {
    %c0_i32 = arith.constant 0 : i32
    %c0_i32_0 = arith.constant 0 : i32
    %c0_i32_1 = arith.constant 0 : i32
    return %arg0, %c0_i32, %c0_i32_0 : i32, i32, i32
  }
  func.func @transform_3(%arg0: i32, %arg1: memref<2xi32, #tpu.memory_space<smem>>) -> (i32, i32) {
    %c0_i32 = arith.constant 0 : i32
    %c0_i32_0 = arith.constant 0 : i32
    %c0_i32_1 = arith.constant 0 : i32
    return %c0_i32, %c0_i32_0 : i32, i32
  }
  func.func @transform_4(%arg0: i32, %arg1: memref<2xi32, #tpu.memory_space<smem>>) -> (i32, i32) {
    %c0_i32 = arith.constant 0 : i32
    %c0_i32_0 = arith.constant 0 : i32
    %c0_i32_1 = arith.constant 0 : i32
    return %c0_i32, %c0_i32_0 : i32, i32
  }
  func.func @transform_5(%arg0: i32, %arg1: memref<2xi32, #tpu.memory_space<smem>>) -> (i32, i32) {
    %c0_i32 = arith.constant 0 : i32
    %c0_i32_0 = arith.constant 0 : i32
    %c0_i32_1 = arith.constant 0 : i32
    return %c0_i32, %c0_i32_0 : i32, i32
  }
  func.func @transform_6(%arg0: i32, %arg1: memref<2xi32, #tpu.memory_space<smem>>) -> (i32, i32) {
    %c0_i32 = arith.constant 0 : i32
    %c0_i32_0 = arith.constant 0 : i32
    %c0_i32_1 = arith.constant 0 : i32
    return %c0_i32, %c0_i32_0 : i32, i32
  }
  func.func @transform_7(%arg0: i32, %arg1: memref<2xi32, #tpu.memory_space<smem>>) -> (i32, i32, i32) {
    %c0_i32 = arith.constant 0 : i32
    %c0_i32_0 = arith.constant 0 : i32
    %c0_i32_1 = arith.constant 0 : i32
    return %arg0, %c0_i32, %c0_i32_0 : i32, i32, i32
  }
}

</mosaic_0001>

<bundles_post_ra>
// kernel: multi_head_attention.1
= control target key start
LH: loop header
LB: loop body
LE: loop exit
PB: predicated region body
PF: predicated region fallthrough
CT: control target
= control target key end

     0   :  { %s1090_s30 = smov [#allocation3]   ;;  %s1338_s0 = inlined_call_operand.vmem [shape: s32[2], index: 0, kind: input, shape index: {}]   ;;  %s1339_s1 = inlined_call_operand.vmem [shape: f32[2,8,32], index: 1, kind: input, shape index: {}]   ;;  %s1340_s2 = inlined_call_operand.vmem [shape: f32[2,8,32], index: 2, kind: input, shape index: {}]   ;;  %s1341_s3 = inlined_call_operand.vmem [shape: f32[2,8,32], index: 3, kind: input, shape index: {}]   ;;  %s1342_s4 = inlined_call_operand.vmem [shape: f32[32,32], index: 4, kind: input, shape index: {}]   ;;  %s1343_s5 = inlined_call_operand.vmem [shape: f32[32,32], index: 5, kind: input, shape index: {}]   ;;  %s1344_s6 = inlined_call_operand.vmem [shape: f32[32,32], index: 6, kind: input, shape index: {}]   ;;  %s1345_s7 = inlined_call_operand.vmem [shape: f32[32,32], index: 7, kind: input, shape index: {}]   ;;  %s1346_s8 = inlined_call_operand.hbm [shape: f32[2,8,32], index: 8, kind: output, shape index: {}]  }
   0x1   :  { %s14_s29 = sshll.u32 %s1338_s0, 4  ;;  %s15_s29 = int_to_ptr.vmem [resolvable:$true] %s14_s29 }
   0x2   :  { %17 = dma.vmem_to_smem %s15_s29, 16, %s1090_s30, [#allocation2] }
   0x3   :  { %1068 = dma.done.wait [#allocation2], 16 }
   0x4   :  { %1069 = vsyncadd [#allocation2], 4294967280 }
   0x5   :  { %20 = sfence }
   0x6   :  { %21 = vsyncpa [#allocation5], 0 }
   0x7   :  { %23 = vsyncpa [#allocation5 + $0x1], 0  ;;  %s1142_s9 = smov 0   ;;  %s1144_s10 = smov 0  }
   0x8   :  { %s1146_s11 = smov 0   ;;  %s1148_s12 = smov 0  }
   0x9 LB: > { %s1163_s0 = sadd.s32 4294967295, %s1088_s12   ;;  %s922_s13 = sadd.s32 4294967294, %s1088_s12   ;;  %s1088_s12 = sphi %s1148_s12, %s1354_s12   ;;  %s1084_s11 = sphi %s1146_s11, %s1353_s11   ;;  %s1080_s10 = sphi %s1144_s10, %s1352_s10   ;;  %s1076_s9 = sphi %s1142_s9, %s1351_s9  }
   0xa   : > { %s1167_s14 = sadd.s32 1, %s1088_s12   ;;  %s198_s15 = sadd.s32 1, %s1084_s11 }
   0xb   : > { %s195_s16 = ssub.s32 %s1088_s12, %s1167_s14  ;;  %p208_p0 = scmp.ne.s32.totalorder %s1084_s11, %s1080_s10 }
   0xc   : > { %p196_p1 = scmp.eq.s32.totalorder %s195_s16, 0  ;;  %p209_p2 = scmp.eq.s32.totalorder %s1163_s0, 1 }
   0xd   : > { %p214_p3 = scmp.ne.s32.totalorder %s1080_s10, %s1076_s9  ;;  %p215_p4 = scmp.eq.s32.totalorder %s922_s13, 1 }
   0xe   : > { %s1178_s17 = scalar_select %p196_p1, %s1084_s11, %s198_s15  }
   0xf   : > { %p1180_p5 = por %p209_p2, %p208_p0  ;;  %p1184_p6 = por %p215_p4, %p214_p3 }
  0x10   : > { %p925_p7 = scmp.ge.s32.totalorder %s1088_s12, 1  ;;  %p266_p8 = scmp.lt.s32.totalorder %s1088_s12, 3 }
  0x12   : > { %p267_p9 = pnand %p925_p7, %p266_p8 }
  0x13   : > { %p305_p10 = scmp.lt.s32.totalorder (!%p267_p9), %s1163_s0, 1  ;;  %s1091_s28 = smov (!%p267_p9), 104  }
  0x14   : > { %270 = sbr.rel (%p267_p9) target bundleno = 1079 (0x437), region = 48  ;;  %s1093_s29 = smov (!%p267_p9), 120  }
  0x15   : > { %s302_s26 = sand.u32 (!%p267_p9), 1, %s1080_s10  }
  0x16   : > { %s926_s27 = sshll.u32 (!%p267_p9), %s302_s26, 3 }
  0x17   : > { %s304_s13 = scalar_lea.vmem (!%p267_p9), [#allocation4], %s926_s27 }
  0x18   : > { %s836_s16 = sshll.u32 (!%p267_p9), %s304_s13, 4  ;;  %s837_s16 = int_to_ptr.vmem [resolvable:$true] %s836_s16 }
  0x19   : > { %v351_v0 = vld [vmem:[%s1343_s5 + $0x18] sm:$0xff]  ;;  %v350_v1 = vld [vmem:[%s1343_s5 + $0x10] sm:$0xff]  ;;  %v349_v4 = vld [vmem:[%s1343_s5 + $0x8] sm:$0xff]  ;;  %s306_s15 = scalar_select %p305_p10, %s1163_s0, 1  ;;  %vm324_vm0 = vcmask 261120   ;;  %vm407_vm1 = vcmask 64512   ;;  %v402_v24 = vlaneseq }
  0x1a   : > { %v323_v2 = vld [vmem:[%s1342_s4 + $0x18] sm:$0xff]  ;;  %367 = vmatpush.msra.mxu1 %v351_v0  ;;  %v322_v3 = vld [vmem:[%s1342_s4 + $0x10] sm:$0xff]  ;;  %v321_v5 = vld [vmem:[%s1342_s4 + $0x8] sm:$0xff] }
  0x1b   : > { %340 = vmatpush.msra.mxu0 %v323_v2  ;;  %v378_v6 = vld [vmem:[%s1344_s6 + $0x18] sm:$0xff]  ;;  %v377_v7 = vld [vmem:[%s1344_s6 + $0x10] sm:$0xff]  ;;  %v348_v8 = vld [vmem:[%s1343_s5] sm:$0xff]  ;;  %s927_s25 = sshll.u32 %s306_s15, 3  ;;  %v403_v25 = vand.u32 127, %v402_v24  ;;  %s824_s15 = scalar_lea.sflag [#allocation5], %s302_s26 }
  0x1c   : > { %368 = vmatpush.msra.mxu1 %v350_v1  ;;  %v320_v9 = vld [vmem:[%s1342_s4] sm:$0xff]  ;;  %394 = vmatpush.msra.mxu2 %v378_v6  ;;  %s312_s30 = scalar_lea.vmem %s1340_s2, %s927_s25  ;;  %s308_s20 = scalar_lea.vmem %s1339_s1, %s927_s25  ;;  %v376_v12 = vld [vmem:[%s1344_s6 + $0x8] sm:$0xff] }
  0x1d   : > { %341 = vmatpush.msra.mxu0 %v322_v3  ;;  %v318_v10 = vld [vmem:[%s312_s30] sm:$0xff]  ;;  %s316_s24 = scalar_lea.vmem %s1341_s3, %s927_s25  ;;  %s1092_s25 = smov 112  }
  0x1e   : > { %369 = vmatpush.msra.mxu1 %v349_v4  ;;  %v317_v11 = vld [vmem:[%s308_s20] sm:$0xff]  ;;  %395 = vmatpush.msra.mxu2 %v377_v7  ;;  %s404_s30 = sld [smem:[#allocation3 + %s1163_s0]] }
  0x1f   : > { %342 = vmatpush.msra.mxu0 %v321_v5  ;;  %v375_v13 = vld [vmem:[%s1344_s6] sm:$0xff] }
  0x20   : > { %370 = vmatpush.msra.mxu1 %v348_v8  ;;  %396 = vmatpush.msra.mxu2 %v376_v12  ;;  %v319_v14 = vld [vmem:[%s316_s24] sm:$0xff]  ;;  %s1044_s24 = scalar_lea.hbm %s1346_s8, 16 }
  0x21   : > { %343 = vmatpush.msra.mxu0 %v320_v9  ;;  %931 = vmatmul.msk.f32.vlgmr.msra.gmra.mxu1 %vm324_vm0, %v318_v10  ;;  %v673_v9 = vld [vmem:[%s1345_s7 + $0x8] sm:$0xff]  ;;  %v645_v10 = vld [vmem:[%s1345_s7] sm:$0xff] }
  0x22   : > { %930 = vmatmul.msk.f32.vlgmr.msra.gmra.mxu0 %vm324_vm0, %v317_v11  ;;  %397 = vmatpush.msra.mxu2 %v375_v13 }
  0x23   : > { %932 = vmatmul.msk.f32.vlgmr.msra.gmra.mxu2 %vm324_vm0, %v319_v14 }
  0x24   : > { %v405_v26 = vstv %s404_s30 }
  0x25   : > { %vm1257_vm2 = vcmp.lt.s32.totalorder %v403_v25, %v405_v26 }
  0x9e   : > { %v372_v15 = vpop.f32.mrf.mxu1 }
  0x9f   : > { %495 = vrot.lane.b32.xlu2 %v372_v15, %s1091_s28  ;;  %466 = vrot.lane.b32.xlu1 %v372_v15, %s1092_s25  ;;  %v345_v16 = vpop.f32.mrf.mxu0 }
  0xa0   : > { %437 = vrot.lane.b32.xlu0 %v372_v15, %s1093_s29  ;;  %933 = vmatpush.xpose.msk.msra.mxu3 %vm407_vm1, %v372_v15 }
  0xa3   : > { %934 = vmatmul.msk.f32.vlgmr.msra.gmra.mxu3 %vm407_vm1, %v345_v16 }
  0xa6   : > { %v1246_v17 = vpop.f32.mrf.mxu2 }
  0xa7   : > { %493 = vrot.lane.b32.xlu2 %v345_v16, %s1091_s28  ;;  %464 = vrot.lane.b32.xlu1 %v345_v16, %s1092_s25 }
  0xa8   : > { %435 = vrot.lane.b32.xlu0 %v345_v16, %s1093_s29  ;;  %640 = vmatpush.msrb.mxu2 %v1246_v17 }
  0xaf   : > { %647 = vrot.lane.b32.xlu2 %v1246_v17, %s1093_s29 }
  0xf9   : > { %v496_v18 = vpop.permute.xlu2 %495 }
  0xfa   : > { %939 = vmatpush.xpose.msk.msrb.mxu1 %vm407_vm1, %v496_v18 }
  0xfe   : > { %715 = vmatpush.msra.mxu1 %v645_v10 }
 0x101   : > { %v494_v19 = vpop.permute.xlu2 %493 }
 0x102   : > { %940 = vmatmul.msk.f32.vlgmr.msrb.gmra.mxu1 %vm407_vm1, %v494_v19 }
 0x109   : > { %v648_v32 = vpop.permute.xlu2 %647 }
 0x111   : > { %v467_v20 = vpop.permute.xlu1 %466 }
 0x112   : > { %v438_v21 = vpop.permute.xlu0 %437  ;;  %937 = vmatpush.xpose.msk.msrb.mxu0 %vm407_vm1, %v467_v20 }
 0x113   : > { %935 = vmatpush.xpose.msk.msrb.mxu3 %vm407_vm1, %v438_v21 }
 0x116   : > { %692 = vmatpush.msra.mxu0 %v673_v9 }
 0x117   : > { %668 = vmatpush.msra.mxu3 %v648_v32 }
 0x119   : > { %v465_v22 = vpop.permute.xlu1 %464 }
 0x11a   : > { %v436_v23 = vpop.permute.xlu0 %435  ;;  %938 = vmatmul.msk.f32.vlgmr.msrb.gmra.mxu0 %vm407_vm1, %v465_v22 }
 0x11b   : > { %936 = vmatmul.msk.f32.vlgmr.msrb.gmra.mxu3 %vm407_vm1, %v436_v23 }
 0x126   : > { %v431_v27 = vpop.f32.mrf.mxu3 }
 0x127   : > { %v434_v29 = vmul.f32 0.35355338, %v431_v27 }
 0x129   : > { %v522_v30 = vsel %vm1257_vm2, %v434_v29, -1000000.0 }
 0x12a   : > { %v526_v31 = vsel %vm407_vm1, %v522_v30, -inf }
 0x12b   : > { %527 = vmax.xlane.f32.xlu2 %v526_v31 }
 0x17f   : > { %v518_v51 = vpop.f32.mrf.mxu1 }
 0x180   : > { %v521_v55 = vmul.f32 0.35355338, %v518_v51 }
 0x182   : > { %v525_v59 = vsel %vm1257_vm2, %v521_v55, -1000000.0 }
 0x183   : > { %v535_v0 = vsel %vm407_vm1, %v525_v59, -inf }
 0x197   : > { %v489_v37 = vpop.f32.mrf.mxu0 }
 0x198   : > { %v492_v41 = vmul.f32 0.35355338, %v489_v37 }
 0x19a   : > { %v524_v42 = vsel %vm1257_vm2, %v492_v41, -1000000.0 }
 0x19b   : > { %v532_v44 = vsel %vm407_vm1, %v524_v42, -inf }
 0x19e   : > { %v460_v33 = vpop.f32.mrf.mxu3  ;;  %v528_v34 = vpop.xlane.xlu2 %527 }
 0x19f   : > { %v463_v35 = vmul.f32 0.35355338, %v460_v33  ;;  %v538_v36 = vsub.f32 %v522_v30, %v528_v34 }
 0x1a1   : > { %v542_v38 = vmul.f32 1.442695, %v538_v36  ;;  %v523_v39 = vsel %vm1257_vm2, %v463_v35, -1000000.0 }
 0x1a2   : > { %v529_v40 = vsel %vm407_vm1, %v523_v39, -inf }
 0x1a3   : > { %996 = vpow2.f32 %v542_v38  ;;  %530 = vmax.xlane.f32.xlu0 %v529_v40 }
 0x1a9   : > { %v997_v43 = vpop.eup %996 }
 0x1aa   : > { %v550_v45 = vsel %vm407_vm1, %v997_v43, 0.0 }
 0x1ab   : > { %533 = vmax.xlane.f32.xlu0 %v532_v44  ;;  %551 = vadd.xlane.f32.xlu2 %v550_v45 }
 0x1c3   : > { %720 = vrot.lane.b32.xlu2 %v1246_v17, %s1092_s25 }
 0x216   : > { %v531_v46 = vpop.xlane.xlu0 %530 }
 0x217   : > { %v539_v47 = vsub.f32 %v523_v39, %v531_v46 }
 0x219   : > { %v544_v48 = vmul.f32 1.442695, %v539_v47 }
 0x21b   : > { %998 = vpow2.f32 %v544_v48 }
 0x21e   : > { %v534_v49 = vpop.xlane.xlu0 %533  ;;  %v552_v50 = vpop.xlane.xlu2 %551 }
 0x21f   : > { %v540_v52 = vsub.f32 %v524_v42, %v534_v49  ;;  %1000 = vrcp.f32 %v552_v50  ;;  %v573_v63 = vand.u32 2147483648, %v552_v50  ;;  %v571_v2 = vand.u32 2147483647, %v552_v50  ;;  %v746_v42 = vld [vmem:[%s1345_s7 + $0x10] sm:$0xff] }
 0x220   : > { %vm567_vm4 = vweird.f32 %v552_v50  ;;  %765 = vmatpush.msrb.mxu3 %v746_v42 }
 0x221   : > { %v999_v53 = vpop.eup %998  ;;  %v546_v54 = vmul.f32 1.442695, %v540_v52  ;;  %v574_v5 = vor.u32 1.1754944e-38, %v573_v63  ;;  %vm572_vm6 = vcmp.eq.f32.partialorder %v571_v2, 8.507059e+37 }
 0x222   : > { %v553_v56 = vsel %vm407_vm1, %v999_v53, 0.0 }
 0x223   : > { %1002 = vpow2.f32 %v546_v54  ;;  %554 = vadd.xlane.f32.xlu1 %v553_v56 }
 0x225   : > { %v1001_v57 = vpop.eup %1000 }
 0x226   : > { %v563_v58 = vmul.f32 %v1001_v57, %v552_v50  ;;  %v721_v60 = vpop.permute.xlu2 %720  ;;  %vm568_vm3 = vweird.f32 %v1001_v57 }
 0x227   : > { %741 = vmatpush.msra.mxu2 %v721_v60  ;;  %vm569_vm5 = vmor %vm567_vm4, %vm568_vm3 }
 0x228   : > { %v564_v61 = vsub.f32 1.0, %v563_v58 }
 0x229   : > { %v1276_v62 = vpop.eup %1002 }
 0x22a   : > { %v565_v1 = vmul.f32 %v1001_v57, %v564_v61  ;;  %v556_v3 = vsel %vm407_vm1, %v1276_v62, 0.0 }
 0x22b   : > { %536 = vmax.xlane.f32.xlu1 %v535_v0  ;;  %557 = vadd.xlane.f32.xlu0 %v556_v3 }
 0x22c   : > { %v566_v4 = vadd.f32 %v1001_v57, %v565_v1 }
 0x22e   : > { %v570_v6 = vsel %vm569_vm5, %v1001_v57, %v566_v4  ;;  %v797_v57 = vld [vmem:[%s1345_s7 + $0x18] sm:$0xff] }
 0x22f   : > { %v575_v7 = vsel %vm572_vm6, %v574_v5, %v570_v6  ;;  %816 = vmatpush.msrb.mxu1 %v797_v57 }
 0x230   : > { %v576_v8 = vmul.f32 %v997_v43, %v575_v7 }
 0x232   : > { %941 = vmatmul.msk.f32.vlgmr.msrb.gmra.mxu2 %vm407_vm1, %v576_v8 }
 0x23f   : > { %771 = vrot.lane.b32.xlu0 %v1246_v17, %s1091_s28  ;;  %s950_s28 = sshll.u32 %s1163_s0, 3 }
 0x240   : > { %s834_s30 = scalar_lea.hbm %s1346_s8, %s950_s28 }
 0x241   : > { %s838_s20 = sshll.u32 %s834_s30, 4  ;;  %s839_s20 = int_to_ptr.hbm [resolvable:$true] %s838_s20 }
 0x242   : > { %s1038_s21 = sshra.s32 %s839_s20, 4  ;;  %s1039_s21 = int_to_ptr.hbm [resolvable:$true] %s1038_s21 }
 0x243   : > { %s1040_s0 = scalar_lea.hbm %s1039_s21, 8  ;;  %p1045_p0 = scmp.lt.s32.totalorder %s1039_s21, %s1346_s8 }
 0x244   : > { %p1041_p11 = scmp.ne.s32.totalorder %s1039_s21, %s1040_s0  ;;  %p1046_p1 = scmp.lt.s32.totalorder %s1044_s24, %s1040_s0 }
 0x246   : > { %p1042_p12 = pnand %p1041_p11, %p1180_p5  ;;  %p1047_p2 = por %p1046_p1, %p1045_p0 }
 0x248   : > { %p1043_p13 = pneg %p1042_p12 }
 0x24a   : > { %p1048_p3 = pnand %p1047_p2, %p1043_p13 }
 0x296   : > { %v555_v11 = vpop.xlane.xlu1 %554 }
 0x297   : > { %1004 = vrcp.f32 %v555_v11  ;;  %v588_v17 = vand.u32 2147483648, %v555_v11  ;;  %v586_v21 = vand.u32 2147483647, %v555_v11  ;;  %vm582_vm8 = vweird.f32 %v555_v11 }
 0x299   : > { %v589_v24 = vor.u32 1.1754944e-38, %v588_v17  ;;  %vm587_vm10 = vcmp.eq.f32.partialorder %v586_v21, 8.507059e+37 }
 0x29d   : > { %v1005_v12 = vpop.eup %1004 }
 0x29e   : > { %v578_v13 = vmul.f32 %v1005_v12, %v555_v11  ;;  %v537_v14 = vpop.xlane.xlu1 %536  ;;  %v558_v15 = vpop.xlane.xlu0 %557  ;;  %vm583_vm7 = vweird.f32 %v1005_v12 }
 0x29f   : > { %v541_v16 = vsub.f32 %v525_v59, %v537_v14  ;;  %1006 = vrcp.f32 %v558_v15  ;;  %vm584_vm9 = vmor %vm582_vm8, %vm583_vm7  ;;  %v603_v31 = vand.u32 2147483648, %v558_v15  ;;  %v601_v33 = vand.u32 2147483647, %v558_v15 }
 0x2a0   : > { %v579_v18 = vsub.f32 1.0, %v578_v13  ;;  %vm597_vm12 = vweird.f32 %v558_v15 }
 0x2a1   : > { %v548_v19 = vmul.f32 1.442695, %v541_v16  ;;  %v604_v36 = vor.u32 1.1754944e-38, %v603_v31  ;;  %vm602_vm14 = vcmp.eq.f32.partialorder %v601_v33, 8.507059e+37 }
 0x2a2   : > { %v580_v20 = vmul.f32 %v1005_v12, %v579_v18 }
 0x2a3   : > { %1008 = vpow2.f32 %v548_v19 }
 0x2a4   : > { %v581_v22 = vadd.f32 %v1005_v12, %v580_v20 }
 0x2a5   : > { %v1007_v23 = vpop.eup %1006 }
 0x2a6   : > { %v585_v25 = vsel %vm584_vm9, %v1005_v12, %v581_v22  ;;  %v593_v26 = vmul.f32 %v1007_v23, %v558_v15  ;;  %vm598_vm11 = vweird.f32 %v1007_v23 }
 0x2a7   : > { %v590_v27 = vsel %vm587_vm10, %v589_v24, %v585_v25  ;;  %vm599_vm13 = vmor %vm597_vm12, %vm598_vm11 }
 0x2a8   : > { %v594_v28 = vsub.f32 1.0, %v593_v26  ;;  %v591_v29 = vmul.f32 %v999_v53, %v590_v27 }
 0x2a9   : > { %v1009_v30 = vpop.eup %1008 }
 0x2aa   : > { %v595_v32 = vmul.f32 %v1007_v23, %v594_v28  ;;  %942 = vmatmul.msk.f32.vlgmr.msra.gmra.mxu3 %vm407_vm1, %v591_v29  ;;  %v559_v34 = vsel %vm407_vm1, %v1009_v30, 0.0 }
 0x2ab   : > { %560 = vadd.xlane.f32.xlu1 %v559_v34 }
 0x2ac   : > { %v596_v35 = vadd.f32 %v1007_v23, %v595_v32 }
 0x2ae   : > { %v600_v37 = vsel %vm599_vm13, %v1007_v23, %v596_v35 }
 0x2af   : > { %v605_v38 = vsel %vm602_vm14, %v604_v36, %v600_v37 }
 0x2b0   : > { %v606_v39 = vmul.f32 %v1276_v62, %v605_v38 }
 0x2b1   : > { %v772_v40 = vpop.permute.xlu0 %771 }
 0x2b2   : > { %945 = vmatmul.msk.f32.vlgmr.msra.gmra.mxu2 %vm407_vm1, %v606_v39  ;;  %792 = vmatpush.msrb.mxu0 %v772_v40 }
 0x2b5   : > { %v642_v41 = vpop.f32.mrf.mxu2 }
 0x2b6   : > { %944 = vmatmul.msk.f32.vlgmr.msra.gmra.mxu1 %vm407_vm1, %v642_v41 }
 0x31e   : > { %v561_v43 = vpop.xlane.xlu1 %560 }
 0x31f   : > { %1010 = vrcp.f32 %v561_v43  ;;  %v618_v48 = vand.u32 2147483648, %v561_v43  ;;  %vm612_vm2 = vweird.f32 %v561_v43  ;;  %v616_v50 = vand.u32 2147483647, %v561_v43 }
 0x321   : > { %v619_v53 = vor.u32 1.1754944e-38, %v618_v48  ;;  %vm617_vm4 = vcmp.eq.f32.partialorder %v616_v50, 8.507059e+37 }
 0x325   : > { %v1011_v44 = vpop.eup %1010 }
 0x326   : > { %v608_v45 = vmul.f32 %v1011_v44, %v561_v43  ;;  %vm613_vm15 = vweird.f32 %v1011_v44 }
 0x327   : > { %vm614_vm3 = vmor %vm612_vm2, %vm613_vm15 }
 0x328   : > { %v609_v46 = vsub.f32 1.0, %v608_v45 }
 0x32a   : > { %v610_v47 = vmul.f32 %v1011_v44, %v609_v46 }
 0x32c   : > { %v611_v49 = vadd.f32 %v1011_v44, %v610_v47 }
 0x32d   : > { %v670_v51 = vpop.f32.mrf.mxu3 }
 0x32e   : > { %v615_v52 = vsel %vm614_vm3, %v1011_v44, %v611_v49  ;;  %943 = vmatmul.msk.f32.vlgmr.msra.gmra.mxu0 %vm407_vm1, %v670_v51 }
 0x32f   : > { %v620_v54 = vsel %vm617_vm4, %v619_v53, %v615_v52 }
 0x330   : > { %v621_v55 = vmul.f32 %v1009_v30, %v620_v54 }
 0x333   : > { %v717_v60 = vpop.f32.mrf.mxu1 }
 0x335   : > { %v743_v56 = vpop.f32.mrf.mxu2 }
 0x336   : > { %946 = vmatmul.msk.f32.vlgmr.msrb.gmra.mxu3 %vm407_vm1, %v743_v56  ;;  %947 = vmatmul.msk.f32.vlgmr.msrb.gmra.mxu0 %vm407_vm1, %v621_v55 }
 0x3ab   : > { %v694_v58 = vpop.f32.mrf.mxu0 }
 0x3ac   : > { %v718_v62 = vadd.f32 %v717_v60, %v694_v58 }
 0x3b3   : > { %v794_v59 = vpop.f32.mrf.mxu0 }
 0x3b4   : > { %948 = vmatmul.msk.f32.vlgmr.msrb.gmra.mxu1 %vm407_vm1, %v794_v59 }
 0x3b9   : > { %v767_v61 = vpop.f32.mrf.mxu3 }
 0x3ba   : > { %v770_v63 = vadd.f32 %v767_v61, %v718_v62 }
 0x431   : > { %v818_v0 = vpop.f32.mrf.mxu1 }
 0x432   : > { %v821_v1 = vadd.f32 %v818_v0, %v770_v63 }
 0x434   : > { %822 = vst.msk [vmem:[%s304_s13] sm:$0xff] %vm324_vm0, %v821_v1 }
 0x435   : > { %1051 = shalt.err (!%p1048_p3)
}
 0x436   : > { %953 = dma.vmem_to_hbm [thread:$0]  (%p1180_p5), %s837_s16, 128, %s839_s20, %s824_s15  }
 0x437 PF: > { %p959_p4 = scmp.ge.s32.totalorder %s1088_s12, 2  ;;  %s850_s26 = sand.u32 1, %s1076_s9  }
 0x438   : > { %s851_s25 = scalar_lea.sflag [#allocation5], %s850_s26 }
 0x439   : > { %p956_p7 = pnand %p959_p4, %p1184_p6 }
 0x43b   : > { %p957_p8 = pneg %p956_p7 }
 0x43d   : > { %1071 = dma.done.wait (%p957_p8), %s851_s25, 128  }
 0x43e   : > { %1073 = vsyncadd (%p957_p8), %s851_s25, 4294967168  ;;  %p26_p9 = scmp.ge.s32.totalorder %s1167_s14, 4   ;;  %s1351_s9 = smov %s1080_s10 }
 0x43f   : > { %s1352_s10 = smov %s1084_s11  ;;  %s1353_s11 = smov %s1178_s17 }
 0x440   : > { %s1354_s12 = smov %s1167_s14  ;;  %28 = sbr.rel (!%p26_p9) target bundleno = 9 (0x9), region = 89 }
 0x445   :  { %857 = vsyncpa [#allocation5], 1 }
 0x446   :  { %859 = vsyncpa [#allocation5 + $0x1], 1 }

</bundles_post_ra>
